<compile_context>
chip_gen: v5e
topology: v5e:2x2
jax: 0.10.0
libtpu: 0.0.40
codegen_flags: <defaults>
</compile_context>

<pallas_src>
import functools

import jax
import jax.numpy as jnp
from jax.experimental import pallas as pl
from jax.experimental.pallas import tpu as pltpu


def _resblock_kernel(x_ref, w1_ref, s1_ref, b1_ref, w2_ref, s2_ref, b2_ref,
                     mask_ref, o_ref, ypad_ref, col_ref, *, W, pad):
    """One batch element per grid step; everything in (channels, H*W) layout.

    x_ref   : (1, Cin, H*W)        f32   lane-dense input tile
    w1_ref  : (Cmid, Cin)          bf16  1x1 conv weight
    s1_ref  : (Cmid, 1)            f32   folded BN1 scale
    b1_ref  : (Cmid, 1)            f32   folded BN1 bias (conv bias folded in)
    w2_ref  : (Cout, 9*Cmid)       bf16  3x3 conv weight in im2col layout
    s2_ref  : (Cout, 1)            f32   folded BN2 scale
    b2_ref  : (Cout, 1)            f32   folded BN2 bias
    mask_ref: (9, H*W)             f32   per-tap zero-padding validity masks
    o_ref   : (1, Cout, H*W)       f32   lane-dense output tile
    ypad_ref: (Cmid, 2*pad + H*W)  f32   VMEM scratch, line-padded y1
    col_ref : (9*Cmid, H*W)        f32   VMEM scratch, im2col slab
    """
    HW = x_ref.shape[2]
    Cmid = w1_ref.shape[0]

    x = x_ref[0]                                            # (Cin, H*W) f32

    # ---- CBL #1: 1x1 conv == one matmul over channels (bf16 -> f32 acc) ----
    y1 = jnp.dot(w1_ref[...], x.astype(jnp.bfloat16),
                 preferred_element_type=jnp.float32)        # (Cmid, H*W)
    y1 = y1 * s1_ref[...] + b1_ref[...]
    y1 = jnp.where(y1 >= 0.0, y1, 0.1 * y1)

    # ---- line-padded copy of y1: zeros left/right of the flattened spatial
    # axis so the 3x3 tap shifts below never read garbage.  Pad strips are
    # 128-lane aligned -> all stores here are unmasked.
    zpad = jnp.zeros((Cmid, pad), jnp.float32)
    ypad_ref[:, 0:pad] = zpad
    ypad_ref[:, pad + HW:2 * pad + HW] = zpad
    ypad_ref[:, pad:pad + HW] = y1

    # ---- im2col: tap (dy, dx) is a lane-shifted read of the padded line plus
    # a border mask (kills the w-wraparound positions).  Sublane offsets of the
    # col writes are multiples of 8 -> aligned f32 stores.
    for t, (dy, dx) in enumerate((dy, dx) for dy in range(3) for dx in range(3)):
        s = (dy - 1) * W + (dx - 1)
        slab = ypad_ref[:, pad + s:pad + s + HW]            # (Cmid, H*W)
        col_ref[t * Cmid:(t + 1) * Cmid, :] = slab * mask_ref[t:t + 1, :]

    # ---- CBL #2: single fused matmul, K = 9*Cmid (instead of 9 tiny ones) ----
    y2 = jnp.dot(w2_ref[...], col_ref[...].astype(jnp.bfloat16),
                 preferred_element_type=jnp.float32)        # (Cout, H*W)
    y2 = y2 * s2_ref[...] + b2_ref[...]
    y2 = jnp.where(y2 >= 0.0, y2, 0.1 * y2)

    # ---- residual add (Cout == Cin); lane-dense unmasked store ----
    o_ref[0] = (y2 + x).astype(o_ref.dtype)


def _tap_masks(H, W):
    """(9, H*W) f32 validity masks for the 9 taps of a SAME-padded 3x3 conv."""
    hw = jnp.arange(H * W)
    h, w = hw // W, hw % W
    rows = []
    for dy in range(3):
        for dx in range(3):
            ok = ((h + dy - 1 >= 0) & (h + dy - 1 < H) &
                  (w + dx - 1 >= 0) & (w + dx - 1 < W))
            rows.append(ok)
    return jnp.stack(rows, axis=0).astype(jnp.float32)


@jax.jit
def resblock_forward(x_nchw, w1, s1, b1, w2_hwio, s2, b2):
    """ResBlock forward.

    x_nchw : (N, Cin, H, W) f32
    w1     : (Cmid, Cin)        1x1 conv weight
    s1, b1 : (Cmid,)            folded BN1 scale / bias (conv bias folded in)
    w2_hwio: (3, 3, Cmid, Cout) 3x3 conv weight (HWIO)
    s2, b2 : (Cout,)            folded BN2 scale / bias
    Returns (N, Cout, H, W) f32.
    """
    N, Cin, H, W = x_nchw.shape
    Cmid = w1.shape[0]
    Cout = w2_hwio.shape[3]
    assert Cout == Cin, "residual add requires out_channel == in_channel"
    HW = H * W
    pad = -(-(W + 1) // 128) * 128   # 128-aligned line pad >= max tap shift

    # NCHW is already (channels, spatial): flattening H,W puts H*W on the
    # 128-lane axis -- lane-dense blocks with zero transposes in the wrapper.
    x_flat = x_nchw.reshape(N, Cin, HW)

    w1_b = w1.astype(jnp.bfloat16)                                   # (Cmid, Cin)
    # im2col weight: row cout, column (dy*3+dx)*Cmid + cmid
    w2_b = jnp.transpose(w2_hwio.reshape(9 * Cmid, Cout), (1, 0)).astype(jnp.bfloat16)

    s1c = s1.reshape(Cmid, 1).astype(jnp.float32)
    b1c = b1.reshape(Cmid, 1).astype(jnp.float32)
    s2c = s2.reshape(Cout, 1).astype(jnp.float32)
    b2c = b2.reshape(Cout, 1).astype(jnp.float32)
    masks = _tap_masks(H, W)                                          # (9, H*W)

    kernel = functools.partial(_resblock_kernel, W=W, pad=pad)

    out_flat = pl.pallas_call(
        kernel,
        out_shape=jax.ShapeDtypeStruct((N, Cout, HW), jnp.float32),
        grid_spec=pltpu.PrefetchScalarGridSpec(
            num_scalar_prefetch=0,
            grid=(N,),
            in_specs=[
                pl.BlockSpec((1, Cin, HW), lambda n: (n, 0, 0)),
                pl.BlockSpec((Cmid, Cin), lambda n: (0, 0)),
                pl.BlockSpec((Cmid, 1), lambda n: (0, 0)),
                pl.BlockSpec((Cmid, 1), lambda n: (0, 0)),
                pl.BlockSpec((Cout, 9 * Cmid), lambda n: (0, 0)),
                pl.BlockSpec((Cout, 1), lambda n: (0, 0)),
                pl.BlockSpec((Cout, 1), lambda n: (0, 0)),
                pl.BlockSpec((9, HW), lambda n: (0, 0)),
            ],
            out_specs=pl.BlockSpec((1, Cout, HW), lambda n: (n, 0, 0)),
            scratch_shapes=[
                pltpu.VMEM((Cmid, 2 * pad + HW), jnp.float32),
                pltpu.VMEM((9 * Cmid, HW), jnp.float32),
            ],
        ),
        compiler_params=pltpu.CompilerParams(
            dimension_semantics=("parallel",),
            vmem_limit_bytes=32 * 1024 * 1024,
        ),
    )(x_flat, w1_b, s1c, b1c, w2_b, s2c, b2c, masks)

    return out_flat.reshape(N, Cout, H, W)


def reference_forward(x_nchw, w1, cb1, g1, beta1, m1, v1,
                      w2_hwio, cb2, g2, beta2, m2, v2, eps=1e-5):
    """Plain-JAX reference (NHWC internally), mirroring the PyTorch module.
    Conv operands are rounded to bf16 like the kernel's MXU inputs; both sides
    accumulate in f32, so the comparison stays tight."""
    q = lambda a: a.astype(jnp.bfloat16).astype(jnp.float32)
    x = jnp.transpose(x_nchw, (0, 2, 3, 1))                          # NHWC
    y = jnp.einsum('nhwc,dc->nhwd', q(x), q(w1)) + cb1
    y = (y - m1) / jnp.sqrt(v1 + eps) * g1 + beta1
    y = jnp.where(y >= 0.0, y, 0.1 * y)
    y = jax.lax.conv_general_dilated(
        q(y), q(w2_hwio), window_strides=(1, 1), padding='SAME',
        dimension_numbers=('NHWC', 'HWIO', 'NHWC')) + cb2
    y = (y - m2) / jnp.sqrt(v2 + eps) * g2 + beta2
    y = jnp.where(y >= 0.0, y, 0.1 * y)
    y = y + x
    return jnp.transpose(y, (0, 3, 1, 2))


if __name__ == "__main__":
    # Small shapes consistent with the module: ResBlock(in_channel=16).
    N, Cin, H, W = 2, 16, 16, 16
    Cmid = Cin // 2          # in_channel // 2
    Cout = Cin               # out_channel defaults to in_channel
    eps = 1e-5

    key = jax.random.PRNGKey(0)
    ks = jax.random.split(key, 12)

    x = jax.random.normal(ks[0], (N, Cin, H, W), jnp.float32)

    # Conv weights (+ biases; nn.Conv2d default bias=True is absorbed by the
    # following BN, so we fold the conv bias into the BN bias term below).
    w1_oihw = jax.random.normal(ks[1], (Cmid, Cin, 1, 1), jnp.float32) * 0.1
    cb1 = jax.random.normal(ks[2], (Cmid,), jnp.float32) * 0.1
    w2_oihw = jax.random.normal(ks[3], (Cout, Cmid, 3, 3), jnp.float32) * 0.1
    cb2 = jax.random.normal(ks[4], (Cout,), jnp.float32) * 0.1

    # BatchNorm parameters (eval-mode running stats), deterministic.
    g1 = 1.0 + 0.1 * jax.random.normal(ks[5], (Cmid,), jnp.float32)
    beta1 = 0.1 * jax.random.normal(ks[6], (Cmid,), jnp.float32)
    m1 = 0.1 * jax.random.normal(ks[7], (Cmid,), jnp.float32)
    v1 = jax.random.uniform(ks[8], (Cmid,), jnp.float32, 0.5, 1.5)

    g2 = 1.0 + 0.1 * jax.random.normal(ks[9], (Cout,), jnp.float32)
    beta2 = 0.1 * jax.random.normal(ks[10], (Cout,), jnp.float32)
    m2 = 0.1 * jax.random.normal(ks[11], (Cout,), jnp.float32)
    v2 = jax.random.uniform(ks[0], (Cout,), jnp.float32, 0.5, 1.5)

    # Kernel-layout weights.
    w1 = w1_oihw[:, :, 0, 0]                        # (Cmid, Cin)
    w2_hwio = jnp.transpose(w2_oihw, (2, 3, 1, 0))  # (3, 3, Cmid, Cout)

    # Fold BN (and conv bias) into per-channel scale/bias:
    #   bn(conv(x)+cb) = (conv(x)+cb-m)/sqrt(v+eps)*g + beta = conv(x)*s + b
    s1 = g1 / jnp.sqrt(v1 + eps)
    b1 = beta1 + (cb1 - m1) * s1
    s2 = g2 / jnp.sqrt(v2 + eps)
    b2 = beta2 + (cb2 - m2) * s2

    out = resblock_forward(x, w1, s1, b1, w2_hwio, s2, b2)
    out = jax.block_until_ready(out)

    ref = reference_forward(x, w1, cb1, g1, beta1, m1, v1,
                            w2_hwio, cb2, g2, beta2, m2, v2, eps=eps)
    ref = jax.block_until_ready(ref)

    assert out.shape == (N, Cout, H, W)
    err = float(jnp.max(jnp.abs(out - ref)))
    assert jnp.allclose(out, ref, atol=5e-3, rtol=5e-3), err
    print("KERNEL_OK")
</pallas_src>

<mosaic_0001>
module attributes {stable_mosaic.version = 11 : i64} {
  func.func @_resblock_kernel(%arg0: i32, %arg1: memref<1x16x256xf32, #tpu.memory_space<vmem>>, %arg2: memref<8x16xbf16, #tpu.memory_space<vmem>>, %arg3: memref<8x1xf32, #tpu.memory_space<vmem>>, %arg4: memref<8x1xf32, #tpu.memory_space<vmem>>, %arg5: memref<16x72xbf16, #tpu.memory_space<vmem>>, %arg6: memref<16x1xf32, #tpu.memory_space<vmem>>, %arg7: memref<16x1xf32, #tpu.memory_space<vmem>>, %arg8: memref<9x256xf32, #tpu.memory_space<vmem>>, %arg9: memref<1x16x256xf32, #tpu.memory_space<vmem>>, %arg10: memref<8x512xf32, #tpu.memory_space<vmem>>, %arg11: memref<72x256xf32, #tpu.memory_space<vmem>>) attributes {dimension_semantics = [#tpu.dimension_semantics<parallel>], iteration_bounds = array<i64: 2>, scalar_prefetch = 0 : i64, scratch_operands = 2 : i64, tpu.core_type = #tpu.core_type<tc>, window_params = [{transform_indices = @transform_0, window_bounds = array<i64: 1, 16, 256>}, {pipeline_mode = #tpu.pipeline_mode<synchronous>, transform_indices = @transform_1, window_bounds = array<i64: 8, 16>}, {pipeline_mode = #tpu.pipeline_mode<synchronous>, transform_indices = @transform_2, window_bounds = array<i64: 8, 1>}, {pipeline_mode = #tpu.pipeline_mode<synchronous>, transform_indices = @transform_3, window_bounds = array<i64: 8, 1>}, {pipeline_mode = #tpu.pipeline_mode<synchronous>, transform_indices = @transform_4, window_bounds = array<i64: 16, 72>}, {pipeline_mode = #tpu.pipeline_mode<synchronous>, transform_indices = @transform_5, window_bounds = array<i64: 16, 1>}, {pipeline_mode = #tpu.pipeline_mode<synchronous>, transform_indices = @transform_6, window_bounds = array<i64: 16, 1>}, {pipeline_mode = #tpu.pipeline_mode<synchronous>, transform_indices = @transform_7, window_bounds = array<i64: 9, 256>}, {transform_indices = @transform_8, window_bounds = array<i64: 1, 16, 256>}]} {
    %c0 = arith.constant 0 : index
    %c0_0 = arith.constant 0 : index
    %c0_1 = arith.constant 0 : index
    %0 = vector.load %arg1[%c0, %c0_0, %c0_1] : memref<1x16x256xf32, #tpu.memory_space<vmem>>, vector<1x16x256xf32>
    %1 = vector.shape_cast %0 : vector<1x16x256xf32> to vector<16x256xf32>
    %c0_2 = arith.constant 0 : index
    %c0_3 = arith.constant 0 : index
    %2 = vector.load %arg2[%c0_2, %c0_3] : memref<8x16xbf16, #tpu.memory_space<vmem>>, vector<8x16xbf16>
    %3 = arith.truncf %1 : vector<16x256xf32> to vector<16x256xbf16>
    %cst = arith.constant dense<0.000000e+00> : vector<8x256xf32>
    %4 = tpu.matmul %2, %3, %cst {dimension_numbers = #tpu.dot_dimension_numbers<[1], [0], [0], [1], [0, 0, 1, 1], [], []>} : vector<8x16xbf16>, vector<16x256xbf16>, vector<8x256xf32> -> vector<8x256xf32>
    %c0_4 = arith.constant 0 : index
    %c0_5 = arith.constant 0 : index
    %5 = vector.load %arg3[%c0_4, %c0_5] : memref<8x1xf32, #tpu.memory_space<vmem>>, vector<8x1xf32>
    %6 = vector.broadcast %5 : vector<8x1xf32> to vector<8x256xf32>
    %7 = arith.mulf %4, %6 : vector<8x256xf32>
    %c0_6 = arith.constant 0 : index
    %c0_7 = arith.constant 0 : index
    %8 = vector.load %arg4[%c0_6, %c0_7] : memref<8x1xf32, #tpu.memory_space<vmem>>, vector<8x1xf32>
    %9 = vector.broadcast %8 : vector<8x1xf32> to vector<8x256xf32>
    %10 = arith.addf %7, %9 : vector<8x256xf32>
    %cst_8 = arith.constant 0.000000e+00 : f32
    %11 = vector.broadcast %cst_8 : f32 to vector<8x256xf32>
    %12 = arith.cmpf oge, %10, %11 : vector<8x256xf32>
    %cst_9 = arith.constant 1.000000e-01 : f32
    %13 = vector.broadcast %cst_9 : f32 to vector<8x256xf32>
    %14 = arith.mulf %13, %10 : vector<8x256xf32>
    %15 = arith.select %12, %10, %14 : vector<8x256xi1>, vector<8x256xf32>
    %cst_10 = arith.constant 0.000000e+00 : f32
    %16 = vector.broadcast %cst_10 : f32 to vector<8x128xf32>
    %c0_11 = arith.constant 0 : index
    %c0_12 = arith.constant 0 : index
    %17 = vector.load %arg10[%c0_11, %c0_12] : memref<8x512xf32, #tpu.memory_space<vmem>>, vector<8x128xf32>
    tpu.vector_store %arg10[%c0_11, %c0_12], %16 {strides = array<i32>} : memref<8x512xf32, #tpu.memory_space<vmem>>, vector<8x128xf32>,
    %c0_13 = arith.constant 0 : index
    %c384 = arith.constant 384 : index
    %18 = vector.load %arg10[%c0_13, %c384] : memref<8x512xf32, #tpu.memory_space<vmem>>, vector<8x128xf32>
    tpu.vector_store %arg10[%c0_13, %c384], %16 {strides = array<i32>} : memref<8x512xf32, #tpu.memory_space<vmem>>, vector<8x128xf32>,
    %c0_14 = arith.constant 0 : index
    %c128 = arith.constant 128 : index
    %19 = vector.load %arg10[%c0_14, %c128] : memref<8x512xf32, #tpu.memory_space<vmem>>, vector<8x256xf32>
    tpu.vector_store %arg10[%c0_14, %c128], %15 {strides = array<i32>} : memref<8x512xf32, #tpu.memory_space<vmem>>, vector<8x256xf32>,
    %c0_15 = arith.constant 0 : index
    %c111 = arith.constant 111 : index
    %20 = vector.load %arg10[%c0_15, %c111] : memref<8x512xf32, #tpu.memory_space<vmem>>, vector<8x256xf32>
    %c0_16 = arith.constant 0 : index
    %c0_17 = arith.constant 0 : index
    %21 = vector.load %arg8[%c0_16, %c0_17] : memref<9x256xf32, #tpu.memory_space<vmem>>, vector<1x256xf32>
    %22 = vector.broadcast %21 : vector<1x256xf32> to vector<8x256xf32>
    %23 = arith.mulf %20, %22 : vector<8x256xf32>
    %c0_18 = arith.constant 0 : index
    %c0_19 = arith.constant 0 : index
    %24 = vector.load %arg11[%c0_18, %c0_19] : memref<72x256xf32, #tpu.memory_space<vmem>>, vector<8x256xf32>
    tpu.vector_store %arg11[%c0_18, %c0_19], %23 {strides = array<i32>} : memref<72x256xf32, #tpu.memory_space<vmem>>, vector<8x256xf32>,
    %c0_20 = arith.constant 0 : index
    %c112 = arith.constant 112 : index
    %25 = vector.load %arg10[%c0_20, %c112] : memref<8x512xf32, #tpu.memory_space<vmem>>, vector<8x256xf32>
    %c1 = arith.constant 1 : index
    %c0_21 = arith.constant 0 : index
    %26 = vector.load %arg8[%c1, %c0_21] : memref<9x256xf32, #tpu.memory_space<vmem>>, vector<1x256xf32>
    %27 = vector.broadcast %26 : vector<1x256xf32> to vector<8x256xf32>
    %28 = arith.mulf %25, %27 : vector<8x256xf32>
    %c8 = arith.constant 8 : index
    %c0_22 = arith.constant 0 : index
    %29 = vector.load %arg11[%c8, %c0_22] : memref<72x256xf32, #tpu.memory_space<vmem>>, vector<8x256xf32>
    tpu.vector_store %arg11[%c8, %c0_22], %28 {strides = array<i32>} : memref<72x256xf32, #tpu.memory_space<vmem>>, vector<8x256xf32>,
    %c0_23 = arith.constant 0 : index
    %c113 = arith.constant 113 : index
    %30 = vector.load %arg10[%c0_23, %c113] : memref<8x512xf32, #tpu.memory_space<vmem>>, vector<8x256xf32>
    %c2 = arith.constant 2 : index
    %c0_24 = arith.constant 0 : index
    %31 = vector.load %arg8[%c2, %c0_24] : memref<9x256xf32, #tpu.memory_space<vmem>>, vector<1x256xf32>
    %32 = vector.broadcast %31 : vector<1x256xf32> to vector<8x256xf32>
    %33 = arith.mulf %30, %32 : vector<8x256xf32>
    %c16 = arith.constant 16 : index
    %c0_25 = arith.constant 0 : index
    %34 = vector.load %arg11[%c16, %c0_25] : memref<72x256xf32, #tpu.memory_space<vmem>>, vector<8x256xf32>
    tpu.vector_store %arg11[%c16, %c0_25], %33 {strides = array<i32>} : memref<72x256xf32, #tpu.memory_space<vmem>>, vector<8x256xf32>,
    %c0_26 = arith.constant 0 : index
    %c127 = arith.constant 127 : index
    %35 = vector.load %arg10[%c0_26, %c127] : memref<8x512xf32, #tpu.memory_space<vmem>>, vector<8x256xf32>
    %c3 = arith.constant 3 : index
    %c0_27 = arith.constant 0 : index
    %36 = vector.load %arg8[%c3, %c0_27] : memref<9x256xf32, #tpu.memory_space<vmem>>, vector<1x256xf32>
    %37 = vector.broadcast %36 : vector<1x256xf32> to vector<8x256xf32>
    %38 = arith.mulf %35, %37 : vector<8x256xf32>
    %c24 = arith.constant 24 : index
    %c0_28 = arith.constant 0 : index
    %39 = vector.load %arg11[%c24, %c0_28] : memref<72x256xf32, #tpu.memory_space<vmem>>, vector<8x256xf32>
    tpu.vector_store %arg11[%c24, %c0_28], %38 {strides = array<i32>} : memref<72x256xf32, #tpu.memory_space<vmem>>, vector<8x256xf32>,
    %c0_29 = arith.constant 0 : index
    %c128_30 = arith.constant 128 : index
    %40 = vector.load %arg10[%c0_29, %c128_30] : memref<8x512xf32, #tpu.memory_space<vmem>>, vector<8x256xf32>
    %c4 = arith.constant 4 : index
    %c0_31 = arith.constant 0 : index
    %41 = vector.load %arg8[%c4, %c0_31] : memref<9x256xf32, #tpu.memory_space<vmem>>, vector<1x256xf32>
    %42 = vector.broadcast %41 : vector<1x256xf32> to vector<8x256xf32>
    %43 = arith.mulf %40, %42 : vector<8x256xf32>
    %c32 = arith.constant 32 : index
    %c0_32 = arith.constant 0 : index
    %44 = vector.load %arg11[%c32, %c0_32] : memref<72x256xf32, #tpu.memory_space<vmem>>, vector<8x256xf32>
    tpu.vector_store %arg11[%c32, %c0_32], %43 {strides = array<i32>} : memref<72x256xf32, #tpu.memory_space<vmem>>, vector<8x256xf32>,
    %c0_33 = arith.constant 0 : index
    %c129 = arith.constant 129 : index
    %45 = vector.load %arg10[%c0_33, %c129] : memref<8x512xf32, #tpu.memory_space<vmem>>, vector<8x256xf32>
    %c5 = arith.constant 5 : index
    %c0_34 = arith.constant 0 : index
    %46 = vector.load %arg8[%c5, %c0_34] : memref<9x256xf32, #tpu.memory_space<vmem>>, vector<1x256xf32>
    %47 = vector.broadcast %46 : vector<1x256xf32> to vector<8x256xf32>
    %48 = arith.mulf %45, %47 : vector<8x256xf32>
    %c40 = arith.constant 40 : index
    %c0_35 = arith.constant 0 : index
    %49 = vector.load %arg11[%c40, %c0_35] : memref<72x256xf32, #tpu.memory_space<vmem>>, vector<8x256xf32>
    tpu.vector_store %arg11[%c40, %c0_35], %48 {strides = array<i32>} : memref<72x256xf32, #tpu.memory_space<vmem>>, vector<8x256xf32>,
    %c0_36 = arith.constant 0 : index
    %c143 = arith.constant 143 : index
    %50 = vector.load %arg10[%c0_36, %c143] : memref<8x512xf32, #tpu.memory_space<vmem>>, vector<8x256xf32>
    %c6 = arith.constant 6 : index
    %c0_37 = arith.constant 0 : index
    %51 = vector.load %arg8[%c6, %c0_37] : memref<9x256xf32, #tpu.memory_space<vmem>>, vector<1x256xf32>
    %52 = vector.broadcast %51 : vector<1x256xf32> to vector<8x256xf32>
    %53 = arith.mulf %50, %52 : vector<8x256xf32>
    %c48 = arith.constant 48 : index
    %c0_38 = arith.constant 0 : index
    %54 = vector.load %arg11[%c48, %c0_38] : memref<72x256xf32, #tpu.memory_space<vmem>>, vector<8x256xf32>
    tpu.vector_store %arg11[%c48, %c0_38], %53 {strides = array<i32>} : memref<72x256xf32, #tpu.memory_space<vmem>>, vector<8x256xf32>,
    %c0_39 = arith.constant 0 : index
    %c144 = arith.constant 144 : index
    %55 = vector.load %arg10[%c0_39, %c144] : memref<8x512xf32, #tpu.memory_space<vmem>>, vector<8x256xf32>
    %c7 = arith.constant 7 : index
    %c0_40 = arith.constant 0 : index
    %56 = vector.load %arg8[%c7, %c0_40] : memref<9x256xf32, #tpu.memory_space<vmem>>, vector<1x256xf32>
    %57 = vector.broadcast %56 : vector<1x256xf32> to vector<8x256xf32>
    %58 = arith.mulf %55, %57 : vector<8x256xf32>
    %c56 = arith.constant 56 : index
    %c0_41 = arith.constant 0 : index
    %59 = vector.load %arg11[%c56, %c0_41] : memref<72x256xf32, #tpu.memory_space<vmem>>, vector<8x256xf32>
    tpu.vector_store %arg11[%c56, %c0_41], %58 {strides = array<i32>} : memref<72x256xf32, #tpu.memory_space<vmem>>, vector<8x256xf32>,
    %c0_42 = arith.constant 0 : index
    %c145 = arith.constant 145 : index
    %60 = vector.load %arg10[%c0_42, %c145] : memref<8x512xf32, #tpu.memory_space<vmem>>, vector<8x256xf32>
    %c8_43 = arith.constant 8 : index
    %c0_44 = arith.constant 0 : index
    %61 = vector.load %arg8[%c8_43, %c0_44] : memref<9x256xf32, #tpu.memory_space<vmem>>, vector<1x256xf32>
    %62 = vector.broadcast %61 : vector<1x256xf32> to vector<8x256xf32>
    %63 = arith.mulf %60, %62 : vector<8x256xf32>
    %c64 = arith.constant 64 : index
    %c0_45 = arith.constant 0 : index
    %64 = vector.load %arg11[%c64, %c0_45] : memref<72x256xf32, #tpu.memory_space<vmem>>, vector<8x256xf32>
    tpu.vector_store %arg11[%c64, %c0_45], %63 {strides = array<i32>} : memref<72x256xf32, #tpu.memory_space<vmem>>, vector<8x256xf32>,
    %c0_46 = arith.constant 0 : index
    %c0_47 = arith.constant 0 : index
    %65 = vector.load %arg5[%c0_46, %c0_47] : memref<16x72xbf16, #tpu.memory_space<vmem>>, vector<16x72xbf16>
    %c0_48 = arith.constant 0 : index
    %c0_49 = arith.constant 0 : index
    %66 = vector.load %arg11[%c0_48, %c0_49] : memref<72x256xf32, #tpu.memory_space<vmem>>, vector<72x256xf32>
    %67 = arith.truncf %66 : vector<72x256xf32> to vector<72x256xbf16>
    %cst_50 = arith.constant dense<0.000000e+00> : vector<16x256xf32>
    %68 = tpu.matmul %65, %67, %cst_50 {dimension_numbers = #tpu.dot_dimension_numbers<[1], [0], [0], [1], [0, 0, 1, 1], [], []>} : vector<16x72xbf16>, vector<72x256xbf16>, vector<16x256xf32> -> vector<16x256xf32>
    %c0_51 = arith.constant 0 : index
    %c0_52 = arith.constant 0 : index
    %69 = vector.load %arg6[%c0_51, %c0_52] : memref<16x1xf32, #tpu.memory_space<vmem>>, vector<16x1xf32>
    %70 = vector.broadcast %69 : vector<16x1xf32> to vector<16x256xf32>
    %71 = arith.mulf %68, %70 : vector<16x256xf32>
    %c0_53 = arith.constant 0 : index
    %c0_54 = arith.constant 0 : index
    %72 = vector.load %arg7[%c0_53, %c0_54] : memref<16x1xf32, #tpu.memory_space<vmem>>, vector<16x1xf32>
    %73 = vector.broadcast %72 : vector<16x1xf32> to vector<16x256xf32>
    %74 = arith.addf %71, %73 : vector<16x256xf32>
    %cst_55 = arith.constant 0.000000e+00 : f32
    %75 = vector.broadcast %cst_55 : f32 to vector<16x256xf32>
    %76 = arith.cmpf oge, %74, %75 : vector<16x256xf32>
    %cst_56 = arith.constant 1.000000e-01 : f32
    %77 = vector.broadcast %cst_56 : f32 to vector<16x256xf32>
    %78 = arith.mulf %77, %74 : vector<16x256xf32>
    %79 = arith.select %76, %74, %78 : vector<16x256xi1>, vector<16x256xf32>
    %80 = arith.addf %79, %1 : vector<16x256xf32>
    %c0_57 = arith.constant 0 : index
    %c0_58 = arith.constant 0 : index
    %c0_59 = arith.constant 0 : index
    %81 = vector.load %arg9[%c0_57, %c0_58, %c0_59] : memref<1x16x256xf32, #tpu.memory_space<vmem>>, vector<1x16x256xf32>
    %82 = vector.shape_cast %81 : vector<1x16x256xf32> to vector<16x256xf32>
    %83 = vector.shape_cast %80 : vector<16x256xf32> to vector<1x16x256xf32>
    tpu.vector_store %arg9[%c0_57, %c0_58, %c0_59], %83 {strides = array<i32>} : memref<1x16x256xf32, #tpu.memory_space<vmem>>, vector<1x16x256xf32>,
    return
  }
  func.func @transform_0(%arg0: i32) -> (i32, i32, i32) {
    %c0_i32 = arith.constant 0 : i32
    %c0_i32_0 = arith.constant 0 : i32
    %c0_i32_1 = arith.constant 0 : i32
    return %arg0, %c0_i32, %c0_i32_0 : i32, i32, i32
  }
  func.func @transform_1(%arg0: i32) -> (i32, i32) {
    %c0_i32 = arith.constant 0 : i32
    %c0_i32_0 = arith.constant 0 : i32
    %c0_i32_1 = arith.constant 0 : i32
    return %c0_i32, %c0_i32_0 : i32, i32
  }
  func.func @transform_2(%arg0: i32) -> (i32, i32) {
    %c0_i32 = arith.constant 0 : i32
    %c0_i32_0 = arith.constant 0 : i32
    %c0_i32_1 = arith.constant 0 : i32
    return %c0_i32, %c0_i32_0 : i32, i32
  }
  func.func @transform_3(%arg0: i32) -> (i32, i32) {
    %c0_i32 = arith.constant 0 : i32
    %c0_i32_0 = arith.constant 0 : i32
    %c0_i32_1 = arith.constant 0 : i32
    return %c0_i32, %c0_i32_0 : i32, i32
  }
  func.func @transform_4(%arg0: i32) -> (i32, i32) {
    %c0_i32 = arith.constant 0 : i32
    %c0_i32_0 = arith.constant 0 : i32
    %c0_i32_1 = arith.constant 0 : i32
    return %c0_i32, %c0_i32_0 : i32, i32
  }
  func.func @transform_5(%arg0: i32) -> (i32, i32) {
    %c0_i32 = arith.constant 0 : i32
    %c0_i32_0 = arith.constant 0 : i32
    %c0_i32_1 = arith.constant 0 : i32
    return %c0_i32, %c0_i32_0 : i32, i32
  }
  func.func @transform_6(%arg0: i32) -> (i32, i32) {
    %c0_i32 = arith.constant 0 : i32
    %c0_i32_0 = arith.constant 0 : i32
    %c0_i32_1 = arith.constant 0 : i32
    return %c0_i32, %c0_i32_0 : i32, i32
  }
  func.func @transform_7(%arg0: i32) -> (i32, i32) {
    %c0_i32 = arith.constant 0 : i32
    %c0_i32_0 = arith.constant 0 : i32
    %c0_i32_1 = arith.constant 0 : i32
    return %c0_i32, %c0_i32_0 : i32, i32
  }
  func.func @transform_8(%arg0: i32) -> (i32, i32, i32) {
    %c0_i32 = arith.constant 0 : i32
    %c0_i32_0 = arith.constant 0 : i32
    %c0_i32_1 = arith.constant 0 : i32
    return %arg0, %c0_i32, %c0_i32_0 : i32, i32, i32
  }
}

</mosaic_0001>

<bundles_post_ra>
// kernel: resblock_forward.1
= control target key start
LH: loop header
LB: loop body
LE: loop exit
PB: predicated region body
PF: predicated region fallthrough
CT: control target
= control target key end

     0   :  { %s994_s27 = smov 0   ;;  %s1165_s0 = inlined_call_operand.vmem [shape: f32[2,16,256], index: 0, kind: input, shape index: {}]   ;;  %s1166_s1 = inlined_call_operand.vmem [shape: bf16[8,16], index: 1, kind: input, shape index: {}]   ;;  %s1167_s2 = inlined_call_operand.vmem [shape: f32[8,1], index: 2, kind: input, shape index: {}]   ;;  %s1168_s3 = inlined_call_operand.vmem [shape: f32[8,1], index: 3, kind: input, shape index: {}]   ;;  %s1169_s4 = inlined_call_operand.vmem [shape: bf16[16,72], index: 4, kind: input, shape index: {}]   ;;  %s1170_s5 = inlined_call_operand.vmem [shape: f32[16,1], index: 5, kind: input, shape index: {}]   ;;  %s1171_s6 = inlined_call_operand.vmem [shape: f32[16,1], index: 6, kind: input, shape index: {}]   ;;  %s1172_s7 = inlined_call_operand.vmem [shape: f32[9,256], index: 7, kind: input, shape index: {}]   ;;  %s1173_s8 = inlined_call_operand.vmem [shape: f32[2,16,256], index: 8, kind: output, shape index: {}]  }
   0x1 LB: > { %s842_s28 = sadd.s32 4294967295, %s938_s27   ;;  %p846_p0 = scmp.ge.s32.totalorder %s938_s27, 1  ;;  %s938_s27 = sphi %s994_s27, %s18_s27  }
   0x2   : > { %p262_p1 = scmp.lt.s32.totalorder %s938_s27, 3 }
   0x4   : > { %p263_p2 = pnand %p846_p0, %p262_p1 }
   0x5   : > { %p296_p3 = scmp.lt.s32.totalorder (!%p263_p2), %s842_s28, 1  ;;  %s941_s13 = smov (!%p263_p2), 17  }
   0x6   : > { %266 = sbr.rel (%p263_p2) target bundleno = 461 (0x1cd), region = 52  ;;  %s942_s15 = smov (!%p263_p2), 15  }
   0x7   : > { %s943_s29 = smov (!%p263_p2), 16   ;;  %s944_s10 = smov (!%p263_p2), 1  }
   0x8   : > { %s945_s11 = smov (!%p263_p2), 113   ;;  %s946_s19 = smov (!%p263_p2), 127  }
   0x9   : > { %s947_s22 = smov (!%p263_p2), 111   ;;  %s948_s23 = smov (!%p263_p2), 112  }
   0xb   : > { %v344_v0 = vld [vmem:[%s1167_s2] sm:$0xff]  ;;  %v860_v1 = vld [vmem:[%s1172_s7 + $0x10] ss:$8 sm:$0x3]  ;;  %v940_v2 = vmov 0   ;;  %s1175_s28 = smov (!%p296_p3, %s842_s28), 1 }
   0xc   : > { %889 = vset.pattern.permute.xlu0 %v940_v2  ;;  %v633_v3 = vperm.slane %v860_v1, 0  ;;  %930 = vset.pattern.permute.xlu1 %v940_v2  ;;  %v858_v4 = vld [vmem:[%s1172_s7 + $0x6] ss:$8 sm:$0x3]  ;;  %s869_s14 = sshll.u32 %s1175_s28, 5  ;;  %v634_v7 = vperm.slane %v860_v1, 1 }
   0xd   : > { %347 = vperm.xlu0 %889, %v344_v0   ;;  %931 = vset.pattern.permute.xlu2 %v940_v2  ;;  %v565_v5 = vperm.slane %v858_v4, 0  ;;  %s300_s18 = scalar_lea.vmem %s1165_s0, %s869_s14  ;;  %v352_v6 = vld [vmem:[%s1168_s3] sm:$0xff]  ;;  %v566_v14 = vperm.slane %v858_v4, 1  ;;  %vm314_vm0 = vcmask 130048   ;;  %vm469_vm1 = vcmask 121856  }
   0xe   : > { %635 = vrot.lane.b32.xlu1 %v633_v3, %s941_s13  ;;  %v1024_v8 = vld [vmem:[%s300_s18] sm:$0xff]  ;;  %v1026_v9 = vld [vmem:[%s300_s18 + $0x10] sm:$0xff]  ;;  %v1028_v10 = vld [vmem:[%s300_s18 + $0x8] sm:$0xff]  ;;  %vm398_vm2 = vcmask 138240   ;;  %vm505_vm5 = vcmask 7168   ;;  %vm452_vm6 = vcmask 924672  }
   0xf   : > { %567 = vrot.lane.b32.xlu2 %v565_v5, %s942_s15  ;;  %v312_v11 = vpack.c.bf16 %v1026_v9, %v1024_v8  ;;  %v1032_v12 = vld [vmem:[%s300_s18 + $0x18] sm:$0xff]  ;;  %v311_v15 = vld [vmem:[%s1166_s1] sm:$0xf]  ;;  %v859_v16 = vld [vmem:[%s1172_s7 + $0x7] ss:$8 sm:$0x3] }
  0x10   : > { %v313_v13 = vpack.c.bf16 %v1032_v12, %v1028_v10  ;;  %v599_v17 = vperm.slane %v859_v16, 0  ;;  %v600_v18 = vperm.slane %v859_v16, 1  ;;  %v857_v19 = vld [vmem:[%s1172_s7 + $0x5] ss:$8 sm:$0x3]  ;;  %vm488_vm7 = vcmask 1039360  }
  0x11   : > { %325 = vmatpush.bf16.msra.mxu0 %v312_v11  ;;  %v531_v20 = vperm.slane %v857_v19, 0  ;;  %v854_v21 = vld [vmem:[%s1172_s7 + $0x2] ss:$8 sm:$0x3]  ;;  %v532_v22 = vperm.slane %v857_v19, 1  ;;  %vm381_vm8 = vcmask 908288  }
  0x12   : > { %338 = vmatpush.bf16.msra.mxu1 %v313_v13  ;;  %v446_v23 = vperm.slane %v854_v21, 0  ;;  %v447_v24 = vperm.slane %v854_v21, 1  ;;  %v855_v25 = vld [vmem:[%s1172_s7 + $0x3] ss:$8 sm:$0x3]  ;;  %vm417_vm9 = vcmask 916480  }
  0x13   : > { %v482_v26 = vperm.slane %v855_v25, 0  ;;  %v483_v27 = vperm.slane %v855_v25, 1  ;;  %v373_v28 = vld [vmem:[%s1172_s7] ss:$8 sm:$0x3]  ;;  %vm700_vm10 = vcmask 1043456  }
  0x14   : > { %851 = vmatmul.msk.bf16.vlgmr.msra.gmra.mxu0 %vm314_vm0, %v311_v15  ;;  %v375_v29 = vperm.slane %v373_v28, 0  ;;  %v853_v30 = vld [vmem:[%s1172_s7 + $0x1] ss:$8 sm:$0x3]  ;;  %v376_v31 = vperm.slane %v373_v28, 1  ;;  %vm696_vm11 = vcmask 588800  }
  0x15   : > { %355 = vperm.xlu0 %889, %v352_v6   ;;  %852 = vmatmul.msk.bf16.vlgmr.msra.gmra.mxu1 %vm314_vm0, %v311_v15  ;;  %v411_v32 = vperm.slane %v853_v30, 0  ;;  %v412_v33 = vperm.slane %v853_v30, 1 }
  0x16   : > { %637 = vrot.lane.b32.xlu1 %v634_v7, %s941_s13 }
  0x17   : > { %569 = vrot.lane.b32.xlu2 %v566_v14, %s942_s15 }
  0x1d   : > { %601 = vrot.lane.b32.xlu0 %v599_v17, %s943_s29 }
  0x1e   : > { %603 = vrot.lane.b32.xlu1 %v600_v18, %s943_s29 }
  0x1f   : > { %533 = vrot.lane.b32.xlu2 %v531_v20, %s944_s10 }
  0x25   : > { %535 = vrot.lane.b32.xlu0 %v532_v22, %s944_s10 }
  0x26   : > { %448 = vrot.lane.b32.xlu1 %v446_v23, %s945_s11 }
  0x27   : > { %450 = vrot.lane.b32.xlu2 %v447_v24, %s945_s11 }
  0x2d   : > { %484 = vrot.lane.b32.xlu0 %v482_v26, %s946_s19 }
  0x2e   : > { %486 = vrot.lane.b32.xlu1 %v483_v27, %s946_s19 }
  0x2f   : > { %377 = vrot.lane.b32.xlu2 %v375_v29, %s947_s22 }
  0x35   : > { %379 = vrot.lane.b32.xlu0 %v376_v31, %s947_s22 }
  0x36   : > { %413 = vrot.lane.b32.xlu1 %v411_v32, %s948_s23 }
  0x37   : > { %415 = vrot.lane.b32.xlu2 %v412_v33, %s948_s23 }
  0x69   : > { %v568_v34 = vpop.permute.xlu2 %567 }
  0x71   : > { %v570_v35 = vpop.permute.xlu2 %569 }
  0x72   : > { %v577_v36 = vmul.f32 0.0, %v570_v35  ;;  %v571_v57 = vsel %vm469_vm1, %v568_v34, %v570_v35 }
  0x74   : > { %585 = vrot.lane.b32.xlu0 %v577_v36, %s945_s11 }
  0x79   : > { %v534_v45 = vpop.permute.xlu2 %533 }
  0x7f   : > { %v348_v37 = vpop.permute.xlu0 %347 }
  0x80   : > { %v636_v38 = vpop.permute.xlu1 %635 }
  0x81   : > { %v451_v58 = vpop.permute.xlu2 %450 }
  0x87   : > { %v356_v39 = vpop.permute.xlu0 %355 }
  0x88   : > { %v638_v40 = vpop.permute.xlu1 %637 }
  0x89   : > { %v645_v41 = vmul.f32 0.0, %v638_v40  ;;  %v639_v61 = vsel %vm398_vm2, %v636_v38, %v638_v40  ;;  %v378_v25 = vpop.permute.xlu2 %377 }
  0x8b   : > { %653 = vrot.lane.b32.xlu1 %v645_v41, %s947_s22 }
  0x8f   : > { %v602_v42 = vpop.permute.xlu0 %601 }
  0x90   : > { %v604_v43 = vpop.permute.xlu1 %603 }
  0x91   : > { %v611_v44 = vmul.f32 0.0, %v604_v43  ;;  %v327_v46 = vpop.f32.mrf.mxu0  ;;  %v605_v59 = vsel %vm314_vm0, %v602_v42, %v604_v43  ;;  %v416_v31 = vpop.permute.xlu2 %415 }
  0x92   : > { %v350_v47 = vmul.f32 %v348_v37, %v327_v46  ;;  %v340_v48 = vpop.f32.mrf.mxu1 }
  0x93   : > { %619 = vrot.lane.b32.xlu2 %v611_v44, %s948_s23  ;;  %v351_v49 = vmul.f32 %v348_v37, %v340_v48  ;;  %v386_v37 = vmul.f32 0.0, %v378_v25  ;;  %v751_v44 = vld [vmem:[%s1171_s6] sm:$0xff] }
  0x94   : > { %v358_v51 = vadd.f32 %v356_v39, %v350_v47 }
  0x95   : > { %v359_v54 = vadd.f32 %v356_v39, %v351_v49 }
  0x96   : > { %vm360_vm3 = vcmp.ge.f32.partialorder %v358_v51, 0.0  ;;  %v362_v55 = vmul.f32 0.1, %v358_v51 }
  0x97   : > { %v536_v50 = vpop.permute.xlu0 %535  ;;  %vm361_vm4 = vcmp.ge.f32.partialorder %v359_v54, 0.0  ;;  %v363_v56 = vmul.f32 0.1, %v359_v54 }
  0x98   : > { %v543_v52 = vmul.f32 0.0, %v536_v50  ;;  %v449_v53 = vpop.permute.xlu1 %448  ;;  %v1079_v60 = vsel %vm360_vm3, %v358_v51, %v362_v55  ;;  %v537_v15 = vsel %vm505_vm5, %v534_v45, %v536_v50 }
  0x99   : > { %v1082_v62 = vsel %vm361_vm4, %v359_v54, %v363_v56  ;;  %v329_v63 = vpop.f32.mrf.mxu0  ;;  %v643_v0 = vmul.f32 %v636_v38, %v1079_v60  ;;  %v575_v1 = vmul.f32 %v568_v34, %v1079_v60  ;;  %v609_v6 = vmul.f32 %v602_v42, %v1079_v60 }
  0x9a   : > { %551 = vrot.lane.b32.xlu1 %v543_v52, %s946_s19  ;;  %v342_v2 = vpop.f32.mrf.mxu1  ;;  %v644_v3 = vmul.f32 %v639_v61, %v1082_v62  ;;  %v576_v4 = vmul.f32 %v571_v57, %v1082_v62  ;;  %v610_v7 = vmul.f32 %v605_v59, %v1082_v62  ;;  %v453_v16 = vsel %vm452_vm6, %v449_v53, %v451_v58  ;;  %v856_v57 = vld [vmem:[%s1172_s7 + $0x4] ss:$8 sm:$0x3] }
  0x9b   : > { %v542_v19 = vmul.f32 %v537_v15, %v1082_v62  ;;  %v457_v20 = vmul.f32 0.0, %v449_v53  ;;  %v458_v21 = vmul.f32 %v453_v16, %v1079_v60  ;;  %v541_v22 = vmul.f32 %v534_v45, %v1079_v60  ;;  %v735_v15 = vld [vmem:[%s1170_s5] sm:$0xff]  ;;  %v736_v16 = vld [vmem:[%s1170_s5 + $0x8] sm:$0xff] }
  0x9c   : > { %v890_v13 = vpack.i.bf16 %v644_v3, %v643_v0  ;;  %v895_v14 = vpack.i.bf16 %v576_v4, %v575_v1  ;;  %v900_v17 = vpack.i.bf16 %v610_v7, %v609_v6  ;;  %v459_v33 = vmul.f32 %v451_v58, %v1082_v62 }
  0x9d   : > { %v910_v26 = vpack.i.bf16 %v458_v21, %v457_v20  ;;  %v905_v27 = vpack.i.bf16 %v542_v19, %v541_v22  ;;  %v424_v43 = vmul.f32 %v416_v31, %v1082_v62  ;;  %v517_v2 = vperm.slane %v856_v57, 0 }
  0x9e   : > { %891 = vrot.lane.b32.xlu0 %v890_v13, %s947_s22  ;;  %896 = vrot.lane.b32.xlu2 %v895_v14, %s945_s11  ;;  %v518_v3 = vperm.slane %v856_v57, 1 }
  0x9f   : > { %v485_v5 = vpop.permute.xlu0 %484 }
  0xa0   : > { %v487_v11 = vpop.permute.xlu1 %486  ;;  %v493_v23 = vmul.f32 0.0, %v485_v5 }
  0xa1   : > { %v489_v18 = vsel %vm488_vm7, %v485_v5, %v487_v11  ;;  %v495_v32 = vmul.f32 %v487_v11, %v1082_v62 }
  0xa2   : > { %901 = vrot.lane.b32.xlu1 %v900_v17, %s948_s23  ;;  %v494_v24 = vmul.f32 %v489_v18, %v1079_v60 }
  0xa4   : > { %v915_v28 = vpack.i.bf16 %v494_v24, %v493_v23 }
  0xa6   : > { %906 = vrot.lane.b32.xlu0 %v905_v27, %s946_s19  ;;  %911 = vrot.lane.b32.xlu2 %v910_v26, %s942_s15  ;;  %v522_v26 = vmul.f32 %v518_v3, %v1082_v62  ;;  %s305_s19 = scalar_lea.vmem %s1173_s8, %s869_s14 }
  0xa7   : > { %v380_v29 = vpop.permute.xlu0 %379 }
  0xa8   : > { %v414_v30 = vpop.permute.xlu1 %413  ;;  %v382_v34 = vsel %vm381_vm8, %v378_v25, %v380_v29  ;;  %v388_v35 = vmul.f32 %v380_v29, %v1082_v62  ;;  %v521_v25 = vmul.f32 %v517_v2, %v1079_v60 }
  0xa9   : > { %v418_v36 = vsel %vm417_vm9, %v414_v30, %v416_v31  ;;  %v387_v38 = vmul.f32 %v382_v34, %v1079_v60  ;;  %v422_v39 = vmul.f32 0.0, %v414_v30  ;;  %v752_v34 = vld [vmem:[%s1171_s6 + $0x8] sm:$0xff] }
  0xaa   : > { %916 = vrot.lane.b32.xlu1 %v915_v28, %s944_s10  ;;  %v423_v40 = vmul.f32 %v418_v36, %v1079_v60 }
  0xab   : > { %v920_v42 = vpack.i.bf16 %v387_v38, %v386_v37 }
  0xac   : > { %v925_v41 = vpack.i.bf16 %v423_v40, %v422_v39 }
  0xae   : > { %467 = vrot.lane.b32.xlu0 %v459_v33, %s942_s15  ;;  %503 = vrot.lane.b32.xlu2 %v495_v32, %s944_s10 }
  0xb2   : > { %396 = vrot.lane.b32.xlu1 %v388_v35, %s941_s13 }
  0xb6   : > { %926 = vrot.lane.b32.xlu2 %v925_v41, %s943_s29  ;;  %921 = vrot.lane.b32.xlu0 %v920_v42, %s941_s13 }
  0xba   : > { %739 = vperm.xlu1 %930, %v735_v15  }
  0xbe   : > { %432 = vrot.lane.b32.xlu0 %v424_v43, %s943_s29  ;;  %744 = vperm.xlu2 %931, %v736_v16  }
  0xc2   : > { %760 = vperm.xlu1 %930, %v752_v34  }
  0xc6   : > { %755 = vperm.xlu0 %889, %v751_v44  }
  0xe6   : > { %v586_v48 = vpop.permute.xlu0 %585 }
  0xed   : > { %v620_v45 = vpop.permute.xlu2 %619 }
  0xf8   : > { %v897_v47 = vpop.permute.xlu2 %896 }
  0xf9   : > { %v899_v61 = vunpack.i.h.bf16 %v897_v47  ;;  %v898_v63 = vunpack.i.l.bf16 %v897_v47 }
  0xfb   : > { %v588_v11 = vsel %vm452_vm6, %v899_v61, %v586_v48  ;;  %v587_v14 = vsel %vm452_vm6, %v898_v63, %v899_v61  ;;  %v871_v48 = vld [vmem:[%s1169_s4] sm:$0xff] }
  0xfd   : > { %v654_v46 = vpop.permute.xlu1 %653 }
 0x100   : > { %v912_v50 = vpop.permute.xlu2 %911 }
 0x101   : > { %v914_v29 = vunpack.i.h.bf16 %v912_v50  ;;  %v913_v30 = vunpack.i.l.bf16 %v912_v50 }
 0x103   : > { %v470_v62 = vsel %vm469_vm1, %v913_v30, %v914_v29 }
 0x108   : > { %v504_v22 = vpop.permute.xlu2 %503 }
 0x10c   : > { %v552_v49 = vpop.permute.xlu1 %551 }
 0x110   : > { %v892_v51 = vpop.permute.xlu0 %891  ;;  %v927_v39 = vpop.permute.xlu2 %926 }
 0x111   : > { %v894_v52 = vunpack.i.h.bf16 %v892_v51  ;;  %v893_v53 = vunpack.i.l.bf16 %v892_v51  ;;  %v929_v40 = vunpack.i.h.bf16 %v927_v39  ;;  %v928_v41 = vunpack.i.l.bf16 %v927_v39 }
 0x113   : > { %v655_v58 = vsel %vm381_vm8, %v893_v53, %v894_v52  ;;  %v656_v59 = vsel %vm381_vm8, %v894_v52, %v654_v46  ;;  %v434_v46 = vsel %vm314_vm0, %v928_v41, %v929_v40 }
 0x114   : > { %v902_v54 = vpop.permute.xlu1 %901  ;;  %v689_v0 = vpack.c.bf16 %v655_v58, %v655_v58  ;;  %v690_v1 = vpack.c.bf16 %v656_v59, %v656_v59 }
 0x115   : > { %v904_v55 = vunpack.i.h.bf16 %v902_v54  ;;  %v903_v56 = vunpack.i.l.bf16 %v902_v54 }
 0x116   : > { %v702_v4 = vsel %vm700_vm10, %v689_v0, 0  ;;  %v705_v5 = vsel %vm700_vm10, %v690_v1, 0 }
 0x117   : > { %v621_v6 = vsel %vm417_vm9, %v903_v56, %v904_v55  ;;  %v622_v7 = vsel %vm417_vm9, %v904_v55, %v620_v45  ;;  %710 = vmatpush.bf16.msra.mxu2 %v702_v4  ;;  %724 = vmatpush.bf16.msra.mxu3 %v705_v5 }
 0x118   : > { %v907_v13 = vpop.permute.xlu0 %906  ;;  %v687_v20 = vpack.c.bf16 %v621_v6, %v587_v14  ;;  %v688_v21 = vpack.c.bf16 %v622_v7, %v588_v11  ;;  %v745_v63 = vpop.permute.xlu2 %744 }
 0x119   : > { %v909_v17 = vunpack.i.h.bf16 %v907_v13  ;;  %v908_v18 = vunpack.i.l.bf16 %v907_v13 }
 0x11b   : > { %711 = vmatpush.bf16.msra.mxu2 %v687_v20  ;;  %725 = vmatpush.bf16.msra.mxu3 %v688_v21  ;;  %v553_v27 = vsel %vm488_vm7, %v908_v18, %v909_v17  ;;  %v554_v28 = vsel %vm488_vm7, %v909_v17, %v552_v49 }
 0x11c   : > { %v917_v19 = vpop.permute.xlu1 %916  ;;  %v685_v31 = vpack.c.bf16 %v553_v27, %v521_v25  ;;  %v686_v32 = vpack.c.bf16 %v554_v28, %v522_v26 }
 0x11d   : > { %v919_v23 = vunpack.i.h.bf16 %v917_v19  ;;  %v918_v24 = vunpack.i.l.bf16 %v917_v19 }
 0x11f   : > { %v506_v33 = vsel %vm505_vm5, %v918_v24, %v919_v23  ;;  %712 = vmatpush.bf16.msra.mxu2 %v685_v31  ;;  %726 = vmatpush.bf16.msra.mxu3 %v686_v32  ;;  %v507_v37 = vsel %vm505_vm5, %v919_v23, %v504_v22 }
 0x120   : > { %v468_v60 = vpop.permute.xlu0 %467  ;;  %v683_v36 = vpack.c.bf16 %v506_v33, %v470_v62 }
 0x121   : > { %v471_v35 = vsel %vm469_vm1, %v914_v29, %v468_v60 }
 0x122   : > { %v684_v38 = vpack.c.bf16 %v507_v37, %v471_v35 }
 0x123   : > { %713 = vmatpush.bf16.msra.mxu2 %v683_v36 }
 0x124   : > { %727 = vmatpush.bf16.msra.mxu3 %v684_v38  ;;  %v397_v49 = vpop.permute.xlu1 %396 }
 0x128   : > { %v922_v42 = vpop.permute.xlu0 %921 }
 0x129   : > { %v924_v43 = vunpack.i.h.bf16 %v922_v42  ;;  %v923_v44 = vunpack.i.l.bf16 %v922_v42 }
 0x12b   : > { %v399_v45 = vsel %vm398_vm2, %v923_v44, %v924_v43  ;;  %v400_v52 = vsel %vm398_vm2, %v924_v43, %v397_v49 }
 0x12c   : > { %v681_v47 = vpack.c.bf16 %v434_v46, %v399_v45  ;;  %v740_v54 = vpop.permute.xlu1 %739 }
 0x12e   : > { %714 = vmatpush.bf16.msra.mxu2 %v681_v47 }
 0x130   : > { %v433_v50 = vpop.permute.xlu0 %432 }
 0x131   : > { %v435_v51 = vsel %vm314_vm0, %v929_v40, %v433_v50  ;;  %865 = vmatmul.msk.bf16.vlgmr.msra.gmra.mxu2 %vm696_vm11, %v871_v48 }
 0x132   : > { %v682_v53 = vpack.c.bf16 %v435_v51, %v400_v52 }
 0x134   : > { %728 = vmatpush.bf16.msra.mxu3 %v682_v53  ;;  %v761_v6 = vpop.permute.xlu1 %760 }
 0x137   : > { %866 = vmatmul.msk.bf16.vlgmr.msra.gmra.mxu3 %vm696_vm11, %v871_v48 }
 0x138   : > { %v756_v57 = vpop.permute.xlu0 %755 }
 0x1b4   : > { %v716_v55 = vpop.f32.mrf.mxu2 }
 0x1b5   : > { %v747_v56 = vmul.f32 %v740_v54, %v716_v55 }
 0x1b7   : > { %v763_v58 = vadd.f32 %v756_v57, %v747_v56 }
 0x1b9   : > { %vm767_vm12 = vcmp.ge.f32.partialorder %v763_v58, 0.0  ;;  %v771_v59 = vmul.f32 0.1, %v763_v58 }
 0x1ba   : > { %v730_v61 = vpop.f32.mrf.mxu3 }
 0x1bb   : > { %v775_v0 = vsel %vm767_vm12, %v763_v58, %v771_v59  ;;  %v748_v1 = vmul.f32 %v740_v54, %v730_v61 }
 0x1bc   : > { %v779_v2 = vadd.f32 %v775_v0, %v1024_v8  ;;  %v718_v3 = vpop.f32.mrf.mxu2 }
 0x1bd   : > { %v764_v4 = vadd.f32 %v756_v57, %v748_v1  ;;  %v749_v5 = vmul.f32 %v745_v63, %v718_v3 }
 0x1be   : > { %783 = vst [vmem:[%s305_s19] sm:$0xff] %v779_v2 }
 0x1bf   : > { %vm768_vm13 = vcmp.ge.f32.partialorder %v764_v4, 0.0  ;;  %v772_v7 = vmul.f32 0.1, %v764_v4  ;;  %v765_v11 = vadd.f32 %v761_v6, %v749_v5 }
 0x1c1   : > { %v776_v13 = vsel %vm768_vm13, %v764_v4, %v772_v7  ;;  %vm769_vm14 = vcmp.ge.f32.partialorder %v765_v11, 0.0  ;;  %v773_v14 = vmul.f32 0.1, %v765_v11 }
 0x1c2   : > { %v780_v15 = vadd.f32 %v776_v13, %v1028_v10  ;;  %v732_v16 = vpop.f32.mrf.mxu3 }
 0x1c3   : > { %v777_v17 = vsel %vm769_vm14, %v765_v11, %v773_v14  ;;  %v750_v18 = vmul.f32 %v745_v63, %v732_v16 }
 0x1c4   : > { %784 = vst [vmem:[%s305_s19 + $0x8] sm:$0xff] %v780_v15  ;;  %v781_v19 = vadd.f32 %v777_v17, %v1026_v9 }
 0x1c5   : > { %v766_v8 = vadd.f32 %v761_v6, %v750_v18 }
 0x1c6   : > { %785 = vst [vmem:[%s305_s19 + $0x10] sm:$0xff] %v781_v19 }
 0x1c7   : > { %vm770_vm15 = vcmp.ge.f32.partialorder %v766_v8, 0.0  ;;  %v774_v20 = vmul.f32 0.1, %v766_v8 }
 0x1c9   : > { %v778_v21 = vsel %vm770_vm15, %v766_v8, %v774_v20 }
 0x1ca   : > { %v782_v22 = vadd.f32 %v778_v21, %v1032_v12 }
 0x1cc   : > { %786 = vst [vmem:[%s305_s19 + $0x18] sm:$0xff] %v782_v22 }
 0x1cd PF: > { %s18_s27 = sadd.s32 1, %s938_s27  }
 0x1ce   : > { %p15_p4 = scmp.ge.s32.totalorder %s18_s27, 4  }
 0x1d0   :  { %17 = sbr.rel (!%p15_p4) target bundleno = 1 (0x1), region = 90 }

</bundles_post_ra>
